<compile_context>
chip_gen: v7x
topology: tpu7x:2x2x1
jax: 0.10.0
libtpu: 0.0.40
codegen_flags: <defaults>
</compile_context>

<pallas_src>
import functools

import jax
import jax.numpy as jnp
from jax.experimental import pallas as pl
from jax.experimental.pallas import tpu as pltpu


def _round_up(n: int, m: int) -> int:
    return ((n + m - 1) // m) * m


def _gelu(x, approximate: bool):
    if approximate:
        # tanh approximation -> EUP (separate VLIW slot); tiny numeric deviation
        # from torch.nn.GELU()'s exact erf default.
        return jax.nn.gelu(x, approximate=True)
    # Exact erf GELU (matches torch.nn.GELU() default).
    return 0.5 * x * (1.0 + jax.lax.erf(x * jnp.float32(0.7071067811865476)))


def adapter_kernel(x_ref, w1_ref, b1_ref, w2_ref, b2_ref, o_ref, *, approximate_gelu):
    x = x_ref[...]                                         # (tm, Hp) f32 (residual)
    # MXU: bf16 inputs, f32 accumulation.
    h = jnp.dot(x.astype(w1_ref.dtype), w1_ref[...],
                preferred_element_type=jnp.float32)        # (tm, Bp)
    h = h + b1_ref[...]                                    # broadcast (1, Bp)
    h = _gelu(h, approximate_gelu)                         # f32 elementwise
    y = jnp.dot(h.astype(w2_ref.dtype), w2_ref[...],
                preferred_element_type=jnp.float32)        # (tm, Hp)
    y = y + b2_ref[...]                                    # broadcast (1, Hp)
    o_ref[...] = (y + x).astype(o_ref.dtype)               # residual add


def _pick_tm(tm_req: int, M: int, Hp: int, Bp: int, x_bytes: int, out_bytes: int,
             w_bytes: int, budget: int = 24 << 20) -> int:
    """Largest row tile (multiple of 8) whose double-buffered working set fits VMEM."""
    tm = _round_up(max(8, min(tm_req, _round_up(M, 8))), 8)
    # Resident weights + biases (double-buffered by default pipelining).
    fixed = 2 * (Hp * Bp + Bp * Hp) * w_bytes + 2 * (Bp + Hp) * 4
    per_row = 2 * Hp * (x_bytes + out_bytes)               # x tile + out tile, 2 bufs
    while tm > 8 and fixed + tm * per_row > budget:
        tm = _round_up(max(8, tm // 2), 8)
    return tm


def adapter_forward(x, w1, b1, w2, b2, *, tm=256,
                    matmul_dtype=jnp.bfloat16, approximate_gelu=False):
    """x: [batch, seq, hidden]; w1: [hidden, bottleneck]; w2: [bottleneck, hidden]."""
    batch, seq, hidden = x.shape
    bottleneck = w1.shape[1]
    M = batch * seq

    # Lane-dense padding of the channel dims (exact — see header comment).
    Hp = _round_up(hidden, 128)
    Bp = _round_up(bottleneck, 128)

    w_bytes = jnp.dtype(matmul_dtype).itemsize
    x_bytes = out_bytes = jnp.dtype(x.dtype).itemsize
    tm = _pick_tm(tm, M, Hp, Bp, x_bytes, out_bytes, w_bytes)
    Mp = _round_up(M, tm)
    grid = (Mp // tm,)

    x2d = jnp.pad(x.reshape(M, hidden), ((0, Mp - M), (0, Hp - hidden)))
    w1p = jnp.pad(w1, ((0, Hp - hidden), (0, Bp - bottleneck))).astype(matmul_dtype)
    w2p = jnp.pad(w2, ((0, Bp - bottleneck), (0, Hp - hidden))).astype(matmul_dtype)
    b1p = jnp.pad(b1, (0, Bp - bottleneck)).reshape(1, Bp).astype(jnp.float32)
    b2p = jnp.pad(b2, (0, Hp - hidden)).reshape(1, Hp).astype(jnp.float32)

    bytes_accessed = int(
        x2d.size * x2d.dtype.itemsize
        + w1p.size * w1p.dtype.itemsize
        + w2p.size * w2p.dtype.itemsize
        + b1p.size * b1p.dtype.itemsize
        + b2p.size * b2p.dtype.itemsize
        + Mp * Hp * x.dtype.itemsize)
    cost = pl.CostEstimate(
        flops=4 * Mp * Hp * Bp,          # two matmuls, 2 flops/MAC
        transcendentals=Mp * Bp,         # one erf/tanh per bottleneck element
        bytes_accessed=bytes_accessed)

    out2d = pl.pallas_call(
        functools.partial(adapter_kernel, approximate_gelu=approximate_gelu),
        out_shape=jax.ShapeDtypeStruct((Mp, Hp), x.dtype),
        grid_spec=pltpu.PrefetchScalarGridSpec(
            num_scalar_prefetch=0,
            grid=grid,
            in_specs=[
                pl.BlockSpec((tm, Hp), lambda i: (i, 0)),   # x tile (pipelined)
                pl.BlockSpec((Hp, Bp), lambda i: (0, 0)),   # W1 (resident)
                pl.BlockSpec((1, Bp), lambda i: (0, 0)),    # b1
                pl.BlockSpec((Bp, Hp), lambda i: (0, 0)),   # W2 (resident)
                pl.BlockSpec((1, Hp), lambda i: (0, 0)),    # b2
            ],
            out_specs=pl.BlockSpec((tm, Hp), lambda i: (i, 0)),
        ),
        compiler_params=pltpu.CompilerParams(
            dimension_semantics=("parallel",)),
        cost_estimate=cost,
    )(x2d, w1p, b1p, w2p, b2p)

    return out2d[:M, :hidden].reshape(batch, seq, hidden)


if __name__ == "__main__":
    # Small shapes implied by the module: Adapter(input_size=32, bottleneck_size=8)
    batch, seq, hidden, bottleneck = 2, 8, 32, 8

    key = jax.random.PRNGKey(0)
    k_x, k_w1, k_b1, k_w2, k_b2 = jax.random.split(key, 5)

    x = jax.random.normal(k_x, (batch, seq, hidden), dtype=jnp.float32)
    # Deterministic synthetic parameters (nn.Linear weights, stored transposed: [in, out]).
    w1 = jax.random.normal(k_w1, (hidden, bottleneck), dtype=jnp.float32) * 0.05
    b1 = jax.random.normal(k_b1, (bottleneck,), dtype=jnp.float32) * 0.05
    w2 = jax.random.normal(k_w2, (bottleneck, hidden), dtype=jnp.float32) * 0.05
    b2 = jax.random.normal(k_b2, (hidden,), dtype=jnp.float32) * 0.05

    out = adapter_forward(x, w1, b1, w2, b2)
    jax.block_until_ready(out)

    # Pure-JAX f32 reference (exact erf GELU). Kernel uses bf16 matmul inputs with
    # f32 accumulation, so tolerance is loosened accordingly.
    x2d = x.reshape(-1, hidden)
    h_ref = x2d @ w1 + b1
    h_ref = 0.5 * h_ref * (1.0 + jax.lax.erf(h_ref / jnp.sqrt(2.0)))
    y_ref = (h_ref @ w2 + b2 + x2d).reshape(batch, seq, hidden)
    assert out.shape == y_ref.shape
    assert jnp.allclose(out, y_ref, atol=2e-2, rtol=2e-2), "mismatch vs reference"

    print("KERNEL_OK")
</pallas_src>

<mosaic_0001>
module attributes {stable_mosaic.version = 11 : i64} {
  func.func @adapter_kernel(%arg0: i32, %arg1: memref<16x128xf32, #tpu.memory_space<vmem>>, %arg2: memref<128x128xbf16, #tpu.memory_space<vmem>>, %arg3: memref<1x128xf32, #tpu.memory_space<vmem>>, %arg4: memref<128x128xbf16, #tpu.memory_space<vmem>>, %arg5: memref<1x128xf32, #tpu.memory_space<vmem>>, %arg6: memref<16x128xf32, #tpu.memory_space<vmem>>) attributes {dimension_semantics = [#tpu.dimension_semantics<parallel>], iteration_bounds = array<i64: 1>, scalar_prefetch = 0 : i64, scratch_operands = 0 : i64, tpu.core_type = #tpu.core_type<tc>, window_params = [{transform_indices = @transform_0, window_bounds = array<i64: 16, 128>}, {pipeline_mode = #tpu.pipeline_mode<synchronous>, transform_indices = @transform_1, window_bounds = array<i64: 128, 128>}, {pipeline_mode = #tpu.pipeline_mode<synchronous>, transform_indices = @transform_2, window_bounds = array<i64: 1, 128>}, {pipeline_mode = #tpu.pipeline_mode<synchronous>, transform_indices = @transform_3, window_bounds = array<i64: 128, 128>}, {pipeline_mode = #tpu.pipeline_mode<synchronous>, transform_indices = @transform_4, window_bounds = array<i64: 1, 128>}, {transform_indices = @transform_5, window_bounds = array<i64: 16, 128>}]} {
    %c0 = arith.constant 0 : index
    %c0_0 = arith.constant 0 : index
    %0 = vector.load %arg1[%c0, %c0_0] : memref<16x128xf32, #tpu.memory_space<vmem>>, vector<16x128xf32>
    %1 = arith.truncf %0 : vector<16x128xf32> to vector<16x128xbf16>
    %c0_1 = arith.constant 0 : index
    %c0_2 = arith.constant 0 : index
    %2 = vector.load %arg2[%c0_1, %c0_2] : memref<128x128xbf16, #tpu.memory_space<vmem>>, vector<128x128xbf16>
    %cst = arith.constant dense<0.000000e+00> : vector<16x128xf32>
    %3 = tpu.matmul %1, %2, %cst {dimension_numbers = #tpu.dot_dimension_numbers<[1], [0], [0], [1], [0, 0, 1, 1], [], []>} : vector<16x128xbf16>, vector<128x128xbf16>, vector<16x128xf32> -> vector<16x128xf32>
    %c0_3 = arith.constant 0 : index
    %c0_4 = arith.constant 0 : index
    %4 = vector.load %arg3[%c0_3, %c0_4] : memref<1x128xf32, #tpu.memory_space<vmem>>, vector<1x128xf32>
    %5 = vector.broadcast %4 : vector<1x128xf32> to vector<16x128xf32>
    %6 = arith.addf %3, %5 : vector<16x128xf32>
    %cst_5 = arith.constant 5.000000e-01 : f32
    %7 = vector.broadcast %cst_5 : f32 to vector<16x128xf32>
    %8 = arith.mulf %7, %6 : vector<16x128xf32>
    %cst_6 = arith.constant 0.707106769 : f32
    %9 = vector.broadcast %cst_6 : f32 to vector<16x128xf32>
    %10 = arith.mulf %6, %9 : vector<16x128xf32>
    %11 = math.erf %10 : vector<16x128xf32>
    %cst_7 = arith.constant 1.000000e+00 : f32
    %12 = vector.broadcast %cst_7 : f32 to vector<16x128xf32>
    %13 = arith.addf %12, %11 : vector<16x128xf32>
    %14 = arith.mulf %8, %13 : vector<16x128xf32>
    %15 = arith.truncf %14 : vector<16x128xf32> to vector<16x128xbf16>
    %c0_8 = arith.constant 0 : index
    %c0_9 = arith.constant 0 : index
    %16 = vector.load %arg4[%c0_8, %c0_9] : memref<128x128xbf16, #tpu.memory_space<vmem>>, vector<128x128xbf16>
    %cst_10 = arith.constant dense<0.000000e+00> : vector<16x128xf32>
    %17 = tpu.matmul %15, %16, %cst_10 {dimension_numbers = #tpu.dot_dimension_numbers<[1], [0], [0], [1], [0, 0, 1, 1], [], []>} : vector<16x128xbf16>, vector<128x128xbf16>, vector<16x128xf32> -> vector<16x128xf32>
    %c0_11 = arith.constant 0 : index
    %c0_12 = arith.constant 0 : index
    %18 = vector.load %arg5[%c0_11, %c0_12] : memref<1x128xf32, #tpu.memory_space<vmem>>, vector<1x128xf32>
    %19 = vector.broadcast %18 : vector<1x128xf32> to vector<16x128xf32>
    %20 = arith.addf %17, %19 : vector<16x128xf32>
    %21 = arith.addf %20, %0 : vector<16x128xf32>
    %c0_13 = arith.constant 0 : index
    %c0_14 = arith.constant 0 : index
    %22 = vector.load %arg6[%c0_13, %c0_14] : memref<16x128xf32, #tpu.memory_space<vmem>>, vector<16x128xf32>
    tpu.vector_store %arg6[%c0_13, %c0_14], %21 {strides = array<i32>} : memref<16x128xf32, #tpu.memory_space<vmem>>, vector<16x128xf32>,
    return
  }
  func.func @transform_0(%arg0: i32) -> (i32, i32) {
    %c0_i32 = arith.constant 0 : i32
    %c0_i32_0 = arith.constant 0 : i32
    return %arg0, %c0_i32 : i32, i32
  }
  func.func @transform_1(%arg0: i32) -> (i32, i32) {
    %c0_i32 = arith.constant 0 : i32
    %c0_i32_0 = arith.constant 0 : i32
    %c0_i32_1 = arith.constant 0 : i32
    return %c0_i32, %c0_i32_0 : i32, i32
  }
  func.func @transform_2(%arg0: i32) -> (i32, i32) {
    %c0_i32 = arith.constant 0 : i32
    %c0_i32_0 = arith.constant 0 : i32
    %c0_i32_1 = arith.constant 0 : i32
    return %c0_i32, %c0_i32_0 : i32, i32
  }
  func.func @transform_3(%arg0: i32) -> (i32, i32) {
    %c0_i32 = arith.constant 0 : i32
    %c0_i32_0 = arith.constant 0 : i32
    %c0_i32_1 = arith.constant 0 : i32
    return %c0_i32, %c0_i32_0 : i32, i32
  }
  func.func @transform_4(%arg0: i32) -> (i32, i32) {
    %c0_i32 = arith.constant 0 : i32
    %c0_i32_0 = arith.constant 0 : i32
    %c0_i32_1 = arith.constant 0 : i32
    return %c0_i32, %c0_i32_0 : i32, i32
  }
  func.func @transform_5(%arg0: i32) -> (i32, i32) {
    %c0_i32 = arith.constant 0 : i32
    %c0_i32_0 = arith.constant 0 : i32
    return %arg0, %c0_i32 : i32, i32
  }
}

</mosaic_0001>

<bundles_post_ra>
// kernel: tpu_custom_call.1
= control target key start
LH: loop header
LB: loop body
LE: loop exit
PB: predicated region body
PF: predicated region fallthrough
CT: control target
= control target key end

     0   :  { %10 = vsyncpa [#allocation3], 0  ;;  %s629_s0 = inlined_call_operand.hbm [shape: f32[16,128], index: 0, kind: input, shape index: {}]   ;;  %s630_s1 = inlined_call_operand.hbm [shape: bf16[128,128], index: 1, kind: input, shape index: {}]   ;;  %s631_s2 = inlined_call_operand.vmem [shape: f32[1,128], index: 2, kind: input, shape index: {}]   ;;  %s632_s3 = inlined_call_operand.hbm [shape: bf16[128,128], index: 3, kind: input, shape index: {}]   ;;  %s633_s4 = inlined_call_operand.vmem [shape: f32[1,128], index: 4, kind: input, shape index: {}]   ;;  %s634_s5 = inlined_call_operand.hbm [shape: f32[16,128], index: 5, kind: output, shape index: {}]  }
   0x1   :  { %11 = vsyncpa [#allocation6], 0 }
   0x2   :  { %12 = vsyncpa [#allocation4], 0  ;;  %s523_s18 = smov [#allocation5]   ;;  %s429_s22 = scalar_lea.hbm %s630_s1, 1024 }
   0x3   :  { %s30_s19 = sshll.u32 %s523_s18, 4  ;;  %p430_p0 = scmp.ne.s32.totalorder %s630_s1, %s429_s22  ;;  %s31_s19 = int_to_ptr.vmem [resolvable:$true] %s30_s19 }
   0x4   :  { %p433_p1 = scmp.lt.u32.totalorder %s429_s22, %s630_s1 }
   0x6   :  { %p435_p2 = pnand %p433_p1, %p430_p0 }
   0x8   :  { %438 = shalt.err (!%p435_p2)
}
   0x9   :  { %s439_s27 = scalar_lea.vmem %s31_s19, 1024  ;;  %p444_p4 = scmp.lt.s32.totalorder %s31_s19, %s31_s19 }
   0xa   :  { %p440_p3 = scmp.ne.s32.totalorder %s31_s19, %s439_s27  ;;  %p445_p5 = scmp.lt.s32.totalorder %s439_s27, %s439_s27 }
   0xc   :  { %p446_p6 = por %p445_p5, %p444_p4 }
   0xe   :  { %p447_p7 = pnand %p446_p6, %p440_p3 }
  0x10   :  { %450 = shalt.err (!%p447_p7)
}
  0x11   :  { %s524_s28 = smov 64   ;;  %s525_s29 = smov 4  }
  0x12   :  { %36 = dma.hbm_to_vmem [thread:$0]  %s630_s1, 1024, %s31_s19, [#allocation6], %s524_s28, %s524_s28, %s525_s29  }
  0x13   :  { %s526_s7 = smov [#allocation2]   ;;  %s451_s11 = scalar_lea.hbm %s629_s0, 256 }
  0x14   :  { %s18_s8 = sshll.u32 %s526_s7, 4  ;;  %p452_p8 = scmp.ne.s32.totalorder %s629_s0, %s451_s11  ;;  %s19_s8 = int_to_ptr.vmem [resolvable:$true] %s18_s8 }
  0x15   :  { %p455_p9 = scmp.lt.u32.totalorder %s451_s11, %s629_s0 }
  0x17   :  { %p457_p10 = pnand %p455_p9, %p452_p8 }
  0x19   :  { %460 = shalt.err (!%p457_p10)
}
  0x1a   :  { %s461_s16 = scalar_lea.vmem %s19_s8, 256  ;;  %p466_p12 = scmp.lt.s32.totalorder %s19_s8, %s19_s8 }
  0x1b   :  { %p462_p11 = scmp.ne.s32.totalorder %s19_s8, %s461_s16  ;;  %p467_p13 = scmp.lt.s32.totalorder %s461_s16, %s461_s16 }
  0x1d   :  { %p468_p0 = por %p467_p13, %p466_p12 }
  0x1f   :  { %p469_p1 = pnand %p468_p0, %p462_p11 }
  0x21   :  { %472 = shalt.err (!%p469_p1)
}
  0x22   :  { %s527_s1 = smov 128   ;;  %s528_s17 = smov 8  }
  0x23   :  { %24 = dma.hbm_to_vmem [thread:$0]  %s629_s0, 256, %s19_s8, [#allocation3], %s527_s1, %s527_s1, %s528_s17  }
  0x24   :  { %s529_s20 = smov [#allocation7]   ;;  %s473_s24 = scalar_lea.hbm %s632_s3, 1024 }
  0x25   :  { %s44_s21 = sshll.u32 %s529_s20, 4  ;;  %p474_p2 = scmp.ne.s32.totalorder %s632_s3, %s473_s24  ;;  %s45_s21 = int_to_ptr.vmem [resolvable:$true] %s44_s21 }
  0x26   :  { %p477_p3 = scmp.lt.u32.totalorder %s473_s24, %s632_s3 }
  0x28   :  { %p479_p4 = pnand %p477_p3, %p474_p2 }
  0x2a   :  { %482 = shalt.err (!%p479_p4)
}
  0x2b   :  { %s483_s6 = scalar_lea.vmem %s45_s21, 1024  ;;  %p488_p6 = scmp.lt.s32.totalorder %s45_s21, %s45_s21 }
  0x2c   :  { %p484_p5 = scmp.ne.s32.totalorder %s45_s21, %s483_s6  ;;  %p489_p7 = scmp.lt.s32.totalorder %s483_s6, %s483_s6 }
  0x2e   :  { %p490_p8 = por %p489_p7, %p488_p6 }
  0x30   :  { %p491_p9 = pnand %p490_p8, %p484_p5 }
  0x32   :  { %494 = shalt.err (!%p491_p9)
}
  0x33   :  { %50 = dma.hbm_to_vmem [thread:$0]  %s632_s3, 1024, %s45_s21, [#allocation6], %s524_s28, %s524_s28, %s525_s29  }
  0x34   :  { %517 = dma.done.wait [#allocation3], 256  }
  0x35   :  { %518 = vsyncadd [#allocation3], 4294967040 }
  0x36   :  { %519 = dma.done.wait [#allocation6], 2048  }
  0x37   :  { %520 = vsyncadd [#allocation6], 4294965248  ;;  %v530_v0 = vmov 0.0   ;;  %vm531_vm0 = vmmov 0   ;;  %v409_v1 = vld [vmem:[#allocation5] sm:$0xff]   ;;  %v410_v2 = vld [vmem:[#allocation5 + $0x8] sm:$0xff]  }
  0x38   :  { %359 = vmatprep.subr.bf16.mxu0 %v530_v0  ;;  %375 = vmatprep.mubr.msk.bf16.mxu0 %vm531_vm0, %v530_v0  ;;  %v411_v3 = vld [vmem:[#allocation5 + $0x10] sm:$0xff]   ;;  %v417_v4 = vld [vmem:[#allocation7] sm:$0xff]   ;;  %v412_v5 = vld [vmem:[#allocation5 + $0x18] sm:$0xff]   ;;  %s532_s8 = smov [#allocation8]  }
  0x39   :  { %379 = vmatprep.subr.bf16.mxu1 %v530_v0  ;;  %395 = vmatprep.mubr.msk.bf16.mxu1 %vm531_vm0, %v530_v0  ;;  %v418_v6 = vld [vmem:[#allocation7 + $0x8] sm:$0xff]   ;;  %v413_v7 = vld [vmem:[#allocation5 + $0x20] sm:$0xff]   ;;  %v415_v9 = vld [vmem:[#allocation5 + $0x30] sm:$0xff]   ;;  %s310_s9 = sshll.u32 %s532_s8, 4  ;;  %s311_s9 = int_to_ptr.vmem [resolvable:$true] %s310_s9 }
  0x3a   :  { %360 = vmatpush3.bf16.msra.mxu0 %v409_v1  ;;  %380 = vmatpush3.bf16.msra.mxu1 %v417_v4  ;;  %v414_v8 = vld [vmem:[#allocation5 + $0x28] sm:$0xff]   ;;  %v416_v10 = vld [vmem:[#allocation5 + $0x38] sm:$0xff]   ;;  %v63_v11 = vld [vmem:[#allocation2] sm:$0xff]  ;;  %s495_s10 = scalar_lea.vmem %s311_s9, 256  ;;  %p500_p11 = scmp.lt.s32.totalorder %s311_s9, %s311_s9 }
  0x3b   :  { %361 = vmatprep.subr.bf16.mxu0 %v530_v0  ;;  %381 = vmatprep.subr.bf16.mxu1 %v530_v0  ;;  %v64_v12 = vld [vmem:[#allocation2 + $0x8] sm:$0xff]  ;;  %v419_v14 = vld [vmem:[#allocation7 + $0x10] sm:$0xff]   ;;  %v421_v16 = vld [vmem:[#allocation7 + $0x20] sm:$0xff]   ;;  %p496_p10 = scmp.ne.s32.totalorder %s311_s9, %s495_s10  ;;  %p501_p12 = scmp.lt.s32.totalorder %s495_s10, %s495_s10 }
  0x3c   :  { %v65_v13 = vpack.c.bf16 %v64_v12, %v63_v11  ;;  %v420_v15 = vld [vmem:[#allocation7 + $0x18] sm:$0xff]   ;;  %v422_v17 = vld [vmem:[#allocation7 + $0x28] sm:$0xff]   ;;  %v423_v18 = vld [vmem:[#allocation7 + $0x30] sm:$0xff]  }
  0x3d   :  { %v424_v19 = vld [vmem:[#allocation7 + $0x38] sm:$0xff]   ;;  %v323_v20 = vld [vmem:[%s631_s2] ss:$0 sm:$0xff]  ;;  %p502_p13 = por %p501_p12, %p500_p11 }
  0x3e   :  { %362 = vmatpush3.bf16.msra.mxu0 %v410_v2  ;;  %382 = vmatpush3.bf16.msra.mxu1 %v418_v6  ;;  %v332_v38 = vld [vmem:[%s633_s4] ss:$0 sm:$0xff] }
  0x3f   :  { %363 = vmatprep.subr.bf16.mxu0 %v530_v0  ;;  %383 = vmatprep.subr.bf16.mxu1 %v530_v0  ;;  %p503_p0 = pnand %p502_p13, %p496_p10 }
  0x42   :  { %364 = vmatpush3.bf16.msra.mxu0 %v411_v3  ;;  %384 = vmatpush3.bf16.msra.mxu1 %v419_v14 }
  0x43   :  { %365 = vmatprep.subr.bf16.mxu0 %v530_v0  ;;  %385 = vmatprep.subr.bf16.mxu1 %v530_v0 }
  0x46   :  { %366 = vmatpush3.bf16.msra.mxu0 %v412_v5  ;;  %386 = vmatpush3.bf16.msra.mxu1 %v420_v15 }
  0x47   :  { %367 = vmatprep.subr.bf16.mxu0 %v530_v0  ;;  %387 = vmatprep.subr.bf16.mxu1 %v530_v0 }
  0x4a   :  { %368 = vmatpush3.bf16.msra.mxu0 %v413_v7  ;;  %388 = vmatpush3.bf16.msra.mxu1 %v421_v16 }
  0x4b   :  { %369 = vmatprep.subr.bf16.mxu0 %v530_v0  ;;  %389 = vmatprep.subr.bf16.mxu1 %v530_v0 }
  0x4e   :  { %370 = vmatpush3.bf16.msra.mxu0 %v414_v8  ;;  %390 = vmatpush3.bf16.msra.mxu1 %v422_v17 }
  0x4f   :  { %371 = vmatprep.subr.bf16.mxu0 %v530_v0  ;;  %391 = vmatprep.subr.bf16.mxu1 %v530_v0 }
  0x52   :  { %372 = vmatpush3.bf16.msra.mxu0 %v415_v9  ;;  %392 = vmatpush3.bf16.msra.mxu1 %v423_v18 }
  0x53   :  { %373 = vmatprep.subr.bf16.mxu0 %v530_v0  ;;  %393 = vmatprep.subr.bf16.mxu1 %v530_v0 }
  0x56   :  { %374 = vmatpush3.bf16.msra.mxu0 %v416_v10  ;;  %394 = vmatpush3.bf16.msra.mxu1 %v424_v19 }
  0x59   :  { %376 = vmatmul.mubr.bf16.vlgmr.msra.gmra.mrb[0].mxu0 %v65_v13 }
 0x12c   :  { %v171_v21 = vpop.f32.mrb[0].mxu0 }
 0x12d   :  { %v172_v22 = vadd.f32 %v323_v20, %v171_v21  ;;  %v377_v23 = vpop.f32.mrb[1].mxu0 }
 0x12e   :  { %v174_v24 = vpop.f32.mrb[2].mxu0 }
 0x12f   :  { %v180_v25 = vmul.f32 0.70710677, %v172_v22  ;;  %v175_v26 = vadd.f32 %v323_v20, %v174_v24  ;;  %v378_v27 = vpop.f32.mrb[3].mxu0  ;;  %v178_v32 = vmul.f32 0.5, %v172_v22 }
 0x131   :  { %425 = verf.f32 %v180_v25  ;;  %v181_v28 = vmul.f32 0.70710677, %v175_v26  ;;  %v179_v33 = vmul.f32 0.5, %v175_v26 }
 0x133   :  { %427 = verf.f32 %v181_v28 }
 0x13b   :  { %v426_v29 = vpop.eup %425 }
 0x13c   :  { %v184_v30 = vadd.f32 1.0, %v426_v29 }
 0x13d   :  { %v428_v31 = vpop.eup %427 }
 0x13e   :  { %v185_v34 = vadd.f32 1.0, %v428_v31  ;;  %v186_v35 = vmul.f32 %v184_v30, %v178_v32 }
 0x140   :  { %v187_v36 = vmul.f32 %v185_v34, %v179_v33 }
 0x142   :  { %v188_v37 = vpack.c.bf16 %v187_v36, %v186_v35 }
 0x144   :  { %396 = vmatmul.mubr.bf16.vlgmr.msra.gmra.mrb[0].mxu1 %v188_v37 }
 0x217   :  { %v294_v39 = vpop.f32.mrb[0].mxu1 }
 0x218   :  { %v295_v40 = vadd.f32 %v332_v38, %v294_v39  ;;  %v397_v41 = vpop.f32.mrb[1].mxu1 }
 0x219   :  { %v297_v42 = vpop.f32.mrb[2].mxu1 }
 0x21a   :  { %v301_v43 = vadd.f32 %v295_v40, %v63_v11  ;;  %v298_v44 = vadd.f32 %v332_v38, %v297_v42  ;;  %v398_v45 = vpop.f32.mrb[3].mxu1 }
 0x21c   :  { %303 = vst [vmem:[#allocation8] sm:$0xff] %v301_v43  ;;  %v302_v46 = vadd.f32 %v298_v44, %v64_v12 }
 0x21e   :  { %304 = vst [vmem:[#allocation8 + $0x8] sm:$0xff] %v302_v46 }
 0x21f   :  { %506 = shalt.err (!%p503_p0)
}
 0x220   :  { %s507_s12 = scalar_lea.hbm %s634_s5, 256 }
 0x221   :  { %p508_p1 = scmp.ne.s32.totalorder %s634_s5, %s507_s12  ;;  %p511_p2 = scmp.lt.u32.totalorder %s507_s12, %s634_s5 }
 0x223   :  { %p513_p3 = pnand %p511_p2, %p508_p1 }
 0x225   :  { %516 = shalt.err (!%p513_p3)
}
 0x226   :  { %316 = dma.vmem_to_hbm [thread:$0]  %s311_s9, 256, %s634_s5, [#allocation4], %s527_s1, %s527_s1, %s528_s17  }
 0x227   :  { %521 = dma.done.wait [#allocation4], 256  }
 0x228   :  { %522 = vsyncadd [#allocation4], 4294967040 }
 0x229   :  { %320 = vsyncpa [#allocation3], 1 }
 0x22a   :  { %321 = vsyncpa [#allocation6], 1 }
 0x22b   :  { %322 = vsyncpa [#allocation4], 1 }

</bundles_post_ra>
